<compile_context>
chip_gen: v6e
topology: v6e:2x2x1
jax: 0.10.0
libtpu: 0.0.40
codegen_flags: <defaults>
</compile_context>

<pallas_src>
import functools
import math

import jax
import jax.numpy as jnp
from jax import lax
from jax.experimental import pallas as pl
from jax.experimental.pallas import tpu as pltpu

NUM_HEADS = 4
HIDDEN = 32
FFN_HIDDEN = 64
BATCH = 2
SEQ = 8
LN_EPS = 1e-5
NEG_INF = -1e30


def _layer_norm(t, gamma, beta):
    mean = jnp.mean(t, axis=-1, keepdims=True)
    var = jnp.mean((t - mean) ** 2, axis=-1, keepdims=True)
    return (t - mean) * lax.rsqrt(var + LN_EPS) * gamma + beta


def encoder_block_kernel(
    x_ref, bias_ref,
    in_wt_ref, in_b_ref, out_wt_ref, out_b_ref,
    g1_ref, b1_ref,
    w1t_ref, fb1_ref, w2t_ref, fb2_ref,
    g2_ref, b2_ref,
    o_ref,
    attn_buf,                    # VMEM scratch (B*S, H)
    *, num_heads,
):
    x = x_ref[...]               # (B*S, H) flattened tokens
    bias = bias_ref[...]         # (B*S, B*S) additive mask: block-diag batch + key padding
    H = x.shape[-1]
    hd = H // num_heads
    scale = 1.0 / math.sqrt(hd)

    # ---- fused QKV in-projection (packed like torch.nn.MultiheadAttention) ----
    # one MXU push: (B*S, H) @ (H, 3H), weights already transposed host-side.
    qkv = jnp.dot(x, in_wt_ref[...], preferred_element_type=jnp.float32) + in_b_ref[...]

    # ---- per-head scaled dot-product attention over the whole flattened batch ----
    # The block-diagonal bias (-1e30 for cross-batch keys and padded keys) makes the
    # joint softmax over B*S keys exactly equal to the per-batch masked softmax.
    for h in range(num_heads):
        q_h = qkv[:, h * hd:(h + 1) * hd]
        k_h = qkv[:, H + h * hd:H + (h + 1) * hd]
        v_h = qkv[:, 2 * H + h * hd:2 * H + (h + 1) * hd]
        # contract last dims directly (no kh.T materialization)
        s = lax.dot_general(q_h, k_h, (((1,), (1,)), ((), ())),
                            preferred_element_type=jnp.float32) * scale + bias
        s = s - jnp.max(s, axis=-1, keepdims=True)
        p = jnp.exp(s)
        denom = jnp.sum(p, axis=-1, keepdims=True)
        r = pl.reciprocal(denom, approx=True)       # EUP vrcp (free slot)
        r = r * (2.0 - denom * r)                   # one Newton step -> f32 accuracy
        p = p * r
        # write this head's output straight into its lane slice (no concat)
        attn_buf[:, h * hd:(h + 1) * hd] = jnp.dot(
            p, v_h, preferred_element_type=jnp.float32)

    attn = attn_buf[...]                            # (B*S, H)

    # ---- out projection ----
    attn_out = jnp.dot(attn, out_wt_ref[...],
                       preferred_element_type=jnp.float32) + out_b_ref[...]

    # ---- AddNorm 1 ----
    y = _layer_norm(x + attn_out, g1_ref[...], b1_ref[...])

    # ---- FFN: Linear -> ReLU -> Linear ----
    hid = jnp.maximum(
        jnp.dot(y, w1t_ref[...], preferred_element_type=jnp.float32) + fb1_ref[...],
        0.0)
    ffn_out = jnp.dot(hid, w2t_ref[...], preferred_element_type=jnp.float32) + fb2_ref[...]

    # ---- AddNorm 2 ----
    o_ref[...] = _layer_norm(y + ffn_out, g2_ref[...], b2_ref[...]).astype(o_ref.dtype)


def transformer_encoder_block(x, mask, params):
    """x: (B, S, H) f32, mask: (B, S) bool (True = pad). Returns (out, mask)."""
    B, S, H = x.shape
    T = B * S
    x2d = x.reshape(T, H)

    # block-diagonal (cross-batch) + key-padding additive bias, built on the host
    batch_ids = jnp.repeat(jnp.arange(B), S)                       # (T,)
    cross = batch_ids[:, None] != batch_ids[None, :]               # (T, T)
    pad = mask.reshape(T)                                          # (T,)
    bias = jnp.where(cross | pad[None, :], NEG_INF, 0.0).astype(jnp.float32)

    # Pre-transpose all weights host-side (one-time cost outside the kernel).
    param_list = [
        params["in_w"].T, params["in_b"],          # (H, 3H), (1, 3H)
        params["out_w"].T, params["out_b"],        # (H, H),  (1, H)
        params["g1"], params["b1"],
        params["w1"].T, params["fb1"],             # (H, F),  (1, F)
        params["w2"].T, params["fb2"],             # (F, H),  (1, H)
        params["g2"], params["b2"],
    ]
    weight_specs = [pl.BlockSpec(p.shape, lambda i: (0, 0)) for p in param_list]

    out2d = pl.pallas_call(
        functools.partial(encoder_block_kernel, num_heads=NUM_HEADS),
        out_shape=jax.ShapeDtypeStruct((T, H), jnp.float32),
        grid_spec=pltpu.PrefetchScalarGridSpec(
            num_scalar_prefetch=0,
            grid=(1,),                               # single step: no per-batch grid overhead
            in_specs=[
                pl.BlockSpec((T, H), lambda i: (0, 0)),
                pl.BlockSpec((T, T), lambda i: (0, 0)),
            ] + weight_specs,
            out_specs=pl.BlockSpec((T, H), lambda i: (0, 0)),
            scratch_shapes=[pltpu.VMEM((T, H), jnp.float32)],
        ),
        compiler_params=pltpu.CompilerParams(dimension_semantics=("arbitrary",)),
    )(x2d, bias, *param_list)
    return out2d.reshape(B, S, H), mask


# ---------------- pure-JAX reference (for correctness check) ----------------
def ref_block(x, mask, p):
    B, S, H = x.shape
    hd = H // NUM_HEADS
    q = x @ p["in_w"][0:H].T + p["in_b"][0, 0:H]
    k = x @ p["in_w"][H:2 * H].T + p["in_b"][0, H:2 * H]
    v = x @ p["in_w"][2 * H:3 * H].T + p["in_b"][0, 2 * H:3 * H]

    def split(t):  # (B,S,H) -> (B,nh,S,hd)
        return t.reshape(B, S, NUM_HEADS, hd).transpose(0, 2, 1, 3)

    qh, kh, vh = split(q), split(k), split(v)
    s = jnp.einsum("bhqd,bhkd->bhqk", qh, kh) / math.sqrt(hd)
    s = s + jnp.where(mask, NEG_INF, 0.0)[:, None, None, :]
    w = jax.nn.softmax(s, axis=-1)
    a = jnp.einsum("bhqk,bhkd->bhqd", w, vh).transpose(0, 2, 1, 3).reshape(B, S, H)
    a = a @ p["out_w"].T + p["out_b"][0]

    def ln(t, g, b):
        m = t.mean(-1, keepdims=True)
        vv = ((t - m) ** 2).mean(-1, keepdims=True)
        return (t - m) / jnp.sqrt(vv + LN_EPS) * g[0] + b[0]

    y = ln(x + a, p["g1"], p["b1"])
    h = jax.nn.relu(y @ p["w1"].T + p["fb1"][0])
    f = h @ p["w2"].T + p["fb2"][0]
    return ln(y + f, p["g2"], p["b2"])


def init_params(key):
    ks = jax.random.split(key, 8)
    H, F = HIDDEN, FFN_HIDDEN
    sc = 0.05
    return {
        "in_w": sc * jax.random.normal(ks[0], (3 * H, H), jnp.float32),
        "in_b": sc * jax.random.normal(ks[1], (1, 3 * H), jnp.float32),
        "out_w": sc * jax.random.normal(ks[2], (H, H), jnp.float32),
        "out_b": sc * jax.random.normal(ks[3], (1, H), jnp.float32),
        "g1": jnp.ones((1, H), jnp.float32),
        "b1": jnp.zeros((1, H), jnp.float32),
        "w1": sc * jax.random.normal(ks[4], (F, H), jnp.float32),
        "fb1": sc * jax.random.normal(ks[5], (1, F), jnp.float32),
        "w2": sc * jax.random.normal(ks[6], (H, F), jnp.float32),
        "fb2": sc * jax.random.normal(ks[7], (1, H), jnp.float32),
        "g2": jnp.ones((1, H), jnp.float32),
        "b2": jnp.zeros((1, H), jnp.float32),
    }


if __name__ == "__main__":
    key = jax.random.PRNGKey(0)
    kx, kp = jax.random.split(key)
    x = jax.random.normal(kx, (BATCH, SEQ, HIDDEN), jnp.float32)
    # key_padding_mask: True = padded position (batch 1 has last 3 tokens padded)
    lengths = jnp.array([SEQ, SEQ - 3])
    mask = jnp.arange(SEQ)[None, :] >= lengths[:, None]
    # NOTE: rows must not be fully padded (fully-masked rows are undefined, as in PyTorch).

    params = init_params(kp)

    out, out_mask = transformer_encoder_block(x, mask, params)
    out = jax.block_until_ready(out)

    ref = ref_block(x, mask, params)
    assert out.shape == (BATCH, SEQ, HIDDEN)
    assert bool(jnp.all(out_mask == mask))
    assert jnp.allclose(out, ref, atol=1e-4, rtol=1e-4), (
        float(jnp.max(jnp.abs(out - ref))))
    print("KERNEL_OK")
</pallas_src>

<mosaic_0001>
module attributes {stable_mosaic.version = 11 : i64} {
  func.func @encoder_block_kernel(%arg0: i32, %arg1: memref<16x32xf32, #tpu.memory_space<vmem>>, %arg2: memref<16x16xf32, #tpu.memory_space<vmem>>, %arg3: memref<32x96xf32, #tpu.memory_space<vmem>>, %arg4: memref<1x96xf32, #tpu.memory_space<vmem>>, %arg5: memref<32x32xf32, #tpu.memory_space<vmem>>, %arg6: memref<1x32xf32, #tpu.memory_space<vmem>>, %arg7: memref<1x32xf32, #tpu.memory_space<vmem>>, %arg8: memref<1x32xf32, #tpu.memory_space<vmem>>, %arg9: memref<32x64xf32, #tpu.memory_space<vmem>>, %arg10: memref<1x64xf32, #tpu.memory_space<vmem>>, %arg11: memref<64x32xf32, #tpu.memory_space<vmem>>, %arg12: memref<1x32xf32, #tpu.memory_space<vmem>>, %arg13: memref<1x32xf32, #tpu.memory_space<vmem>>, %arg14: memref<1x32xf32, #tpu.memory_space<vmem>>, %arg15: memref<16x32xf32, #tpu.memory_space<vmem>>, %arg16: memref<16x32xf32, #tpu.memory_space<vmem>>) attributes {dimension_semantics = [#tpu.dimension_semantics<arbitrary>], iteration_bounds = array<i64: 1>, scalar_prefetch = 0 : i64, scratch_operands = 1 : i64, tpu.core_type = #tpu.core_type<tc>, window_params = [{pipeline_mode = #tpu.pipeline_mode<synchronous>, transform_indices = @transform_0, window_bounds = array<i64: 16, 32>}, {pipeline_mode = #tpu.pipeline_mode<synchronous>, transform_indices = @transform_1, window_bounds = array<i64: 16, 16>}, {pipeline_mode = #tpu.pipeline_mode<synchronous>, transform_indices = @transform_2, window_bounds = array<i64: 32, 96>}, {pipeline_mode = #tpu.pipeline_mode<synchronous>, transform_indices = @transform_3, window_bounds = array<i64: 1, 96>}, {pipeline_mode = #tpu.pipeline_mode<synchronous>, transform_indices = @transform_4, window_bounds = array<i64: 32, 32>}, {pipeline_mode = #tpu.pipeline_mode<synchronous>, transform_indices = @transform_5, window_bounds = array<i64: 1, 32>}, {pipeline_mode = #tpu.pipeline_mode<synchronous>, transform_indices = @transform_6, window_bounds = array<i64: 1, 32>}, {pipeline_mode = #tpu.pipeline_mode<synchronous>, transform_indices = @transform_7, window_bounds = array<i64: 1, 32>}, {pipeline_mode = #tpu.pipeline_mode<synchronous>, transform_indices = @transform_8, window_bounds = array<i64: 32, 64>}, {pipeline_mode = #tpu.pipeline_mode<synchronous>, transform_indices = @transform_9, window_bounds = array<i64: 1, 64>}, {pipeline_mode = #tpu.pipeline_mode<synchronous>, transform_indices = @transform_10, window_bounds = array<i64: 64, 32>}, {pipeline_mode = #tpu.pipeline_mode<synchronous>, transform_indices = @transform_11, window_bounds = array<i64: 1, 32>}, {pipeline_mode = #tpu.pipeline_mode<synchronous>, transform_indices = @transform_12, window_bounds = array<i64: 1, 32>}, {pipeline_mode = #tpu.pipeline_mode<synchronous>, transform_indices = @transform_13, window_bounds = array<i64: 1, 32>}, {pipeline_mode = #tpu.pipeline_mode<synchronous>, transform_indices = @transform_14, window_bounds = array<i64: 16, 32>}]} {
    %c0 = arith.constant 0 : index
    %c0_0 = arith.constant 0 : index
    %0 = vector.load %arg1[%c0, %c0_0] : memref<16x32xf32, #tpu.memory_space<vmem>>, vector<16x32xf32>
    %c0_1 = arith.constant 0 : index
    %c0_2 = arith.constant 0 : index
    %1 = vector.load %arg2[%c0_1, %c0_2] : memref<16x16xf32, #tpu.memory_space<vmem>>, vector<16x16xf32>
    %c0_3 = arith.constant 0 : index
    %c0_4 = arith.constant 0 : index
    %2 = vector.load %arg3[%c0_3, %c0_4] : memref<32x96xf32, #tpu.memory_space<vmem>>, vector<32x96xf32>
    %cst = arith.constant dense<0.000000e+00> : vector<16x96xf32>
    %3 = tpu.matmul %0, %2, %cst {dimension_numbers = #tpu.dot_dimension_numbers<[1], [0], [0], [1], [0, 0, 1, 1], [], []>} : vector<16x32xf32>, vector<32x96xf32>, vector<16x96xf32> -> vector<16x96xf32>
    %c0_5 = arith.constant 0 : index
    %c0_6 = arith.constant 0 : index
    %4 = vector.load %arg4[%c0_5, %c0_6] : memref<1x96xf32, #tpu.memory_space<vmem>>, vector<1x96xf32>
    %5 = vector.broadcast %4 : vector<1x96xf32> to vector<16x96xf32>
    %6 = arith.addf %3, %5 : vector<16x96xf32>
    %7 = vector.extract_strided_slice %6 {offsets = [0, 0], sizes = [16, 8], strides = [1, 1]} : vector<16x96xf32> to vector<16x8xf32>
    %8 = vector.extract_strided_slice %6 {offsets = [0, 32], sizes = [16, 8], strides = [1, 1]} : vector<16x96xf32> to vector<16x8xf32>
    %9 = vector.extract_strided_slice %6 {offsets = [0, 64], sizes = [16, 8], strides = [1, 1]} : vector<16x96xf32> to vector<16x8xf32>
    %cst_7 = arith.constant dense<0.000000e+00> : vector<16x16xf32>
    %10 = tpu.matmul %7, %8, %cst_7 {dimension_numbers = #tpu.dot_dimension_numbers<[1], [1], [0], [0], [0, 0, 1, 0], [], []>} : vector<16x8xf32>, vector<16x8xf32>, vector<16x16xf32> -> vector<16x16xf32>
    %cst_8 = arith.constant 0.353553385 : f32
    %11 = vector.broadcast %cst_8 : f32 to vector<16x16xf32>
    %12 = arith.mulf %10, %11 : vector<16x16xf32>
    %13 = arith.addf %12, %1 : vector<16x16xf32>
    %cst_9 = arith.constant dense<0xFF800000> : vector<16xf32>
    %14 = vector.multi_reduction <maximumf>, %13, %cst_9 [1] : vector<16x16xf32> to vector<16xf32>
    %15 = vector.shape_cast %14 : vector<16xf32> to vector<16x1xf32>
    %16 = vector.broadcast %15 : vector<16x1xf32> to vector<16x16xf32>
    %17 = arith.subf %13, %16 : vector<16x16xf32>
    %18 = math.exp %17 : vector<16x16xf32>
    %cst_10 = arith.constant dense<0.000000e+00> : vector<16xf32>
    %19 = vector.multi_reduction <add>, %18, %cst_10 [1] : vector<16x16xf32> to vector<16xf32>
    %20 = vector.shape_cast %19 : vector<16xf32> to vector<16x1xf32>
    %21 = tpu.reciprocal %20 {approx = true} : vector<16x1xf32> -> vector<16x1xf32>
    %22 = arith.mulf %20, %21 : vector<16x1xf32>
    %cst_11 = arith.constant 2.000000e+00 : f32
    %23 = vector.broadcast %cst_11 : f32 to vector<16x1xf32>
    %24 = arith.subf %23, %22 : vector<16x1xf32>
    %25 = arith.mulf %21, %24 : vector<16x1xf32>
    %26 = vector.broadcast %25 : vector<16x1xf32> to vector<16x16xf32>
    %27 = arith.mulf %18, %26 : vector<16x16xf32>
    %cst_12 = arith.constant dense<0.000000e+00> : vector<16x8xf32>
    %28 = tpu.matmul %27, %9, %cst_12 {dimension_numbers = #tpu.dot_dimension_numbers<[1], [0], [0], [1], [0, 0, 1, 1], [], []>} : vector<16x16xf32>, vector<16x8xf32>, vector<16x8xf32> -> vector<16x8xf32>
    %c0_13 = arith.constant 0 : index
    %c0_14 = arith.constant 0 : index
    %29 = vector.load %arg16[%c0_13, %c0_14] : memref<16x32xf32, #tpu.memory_space<vmem>>, vector<16x8xf32>
    tpu.vector_store %arg16[%c0_13, %c0_14], %28 {strides = array<i32>} : memref<16x32xf32, #tpu.memory_space<vmem>>, vector<16x8xf32>,
    %30 = vector.extract_strided_slice %6 {offsets = [0, 8], sizes = [16, 8], strides = [1, 1]} : vector<16x96xf32> to vector<16x8xf32>
    %31 = vector.extract_strided_slice %6 {offsets = [0, 40], sizes = [16, 8], strides = [1, 1]} : vector<16x96xf32> to vector<16x8xf32>
    %32 = vector.extract_strided_slice %6 {offsets = [0, 72], sizes = [16, 8], strides = [1, 1]} : vector<16x96xf32> to vector<16x8xf32>
    %cst_15 = arith.constant dense<0.000000e+00> : vector<16x16xf32>
    %33 = tpu.matmul %30, %31, %cst_15 {dimension_numbers = #tpu.dot_dimension_numbers<[1], [1], [0], [0], [0, 0, 1, 0], [], []>} : vector<16x8xf32>, vector<16x8xf32>, vector<16x16xf32> -> vector<16x16xf32>
    %cst_16 = arith.constant 0.353553385 : f32
    %34 = vector.broadcast %cst_16 : f32 to vector<16x16xf32>
    %35 = arith.mulf %33, %34 : vector<16x16xf32>
    %36 = arith.addf %35, %1 : vector<16x16xf32>
    %cst_17 = arith.constant dense<0xFF800000> : vector<16xf32>
    %37 = vector.multi_reduction <maximumf>, %36, %cst_17 [1] : vector<16x16xf32> to vector<16xf32>
    %38 = vector.shape_cast %37 : vector<16xf32> to vector<16x1xf32>
    %39 = vector.broadcast %38 : vector<16x1xf32> to vector<16x16xf32>
    %40 = arith.subf %36, %39 : vector<16x16xf32>
    %41 = math.exp %40 : vector<16x16xf32>
    %cst_18 = arith.constant dense<0.000000e+00> : vector<16xf32>
    %42 = vector.multi_reduction <add>, %41, %cst_18 [1] : vector<16x16xf32> to vector<16xf32>
    %43 = vector.shape_cast %42 : vector<16xf32> to vector<16x1xf32>
    %44 = tpu.reciprocal %43 {approx = true} : vector<16x1xf32> -> vector<16x1xf32>
    %45 = arith.mulf %43, %44 : vector<16x1xf32>
    %cst_19 = arith.constant 2.000000e+00 : f32
    %46 = vector.broadcast %cst_19 : f32 to vector<16x1xf32>
    %47 = arith.subf %46, %45 : vector<16x1xf32>
    %48 = arith.mulf %44, %47 : vector<16x1xf32>
    %49 = vector.broadcast %48 : vector<16x1xf32> to vector<16x16xf32>
    %50 = arith.mulf %41, %49 : vector<16x16xf32>
    %cst_20 = arith.constant dense<0.000000e+00> : vector<16x8xf32>
    %51 = tpu.matmul %50, %32, %cst_20 {dimension_numbers = #tpu.dot_dimension_numbers<[1], [0], [0], [1], [0, 0, 1, 1], [], []>} : vector<16x16xf32>, vector<16x8xf32>, vector<16x8xf32> -> vector<16x8xf32>
    %c0_21 = arith.constant 0 : index
    %c8 = arith.constant 8 : index
    %52 = vector.load %arg16[%c0_21, %c8] : memref<16x32xf32, #tpu.memory_space<vmem>>, vector<16x8xf32>
    tpu.vector_store %arg16[%c0_21, %c8], %51 {strides = array<i32>} : memref<16x32xf32, #tpu.memory_space<vmem>>, vector<16x8xf32>,
    %53 = vector.extract_strided_slice %6 {offsets = [0, 16], sizes = [16, 8], strides = [1, 1]} : vector<16x96xf32> to vector<16x8xf32>
    %54 = vector.extract_strided_slice %6 {offsets = [0, 48], sizes = [16, 8], strides = [1, 1]} : vector<16x96xf32> to vector<16x8xf32>
    %55 = vector.extract_strided_slice %6 {offsets = [0, 80], sizes = [16, 8], strides = [1, 1]} : vector<16x96xf32> to vector<16x8xf32>
    %cst_22 = arith.constant dense<0.000000e+00> : vector<16x16xf32>
    %56 = tpu.matmul %53, %54, %cst_22 {dimension_numbers = #tpu.dot_dimension_numbers<[1], [1], [0], [0], [0, 0, 1, 0], [], []>} : vector<16x8xf32>, vector<16x8xf32>, vector<16x16xf32> -> vector<16x16xf32>
    %cst_23 = arith.constant 0.353553385 : f32
    %57 = vector.broadcast %cst_23 : f32 to vector<16x16xf32>
    %58 = arith.mulf %56, %57 : vector<16x16xf32>
    %59 = arith.addf %58, %1 : vector<16x16xf32>
    %cst_24 = arith.constant dense<0xFF800000> : vector<16xf32>
    %60 = vector.multi_reduction <maximumf>, %59, %cst_24 [1] : vector<16x16xf32> to vector<16xf32>
    %61 = vector.shape_cast %60 : vector<16xf32> to vector<16x1xf32>
    %62 = vector.broadcast %61 : vector<16x1xf32> to vector<16x16xf32>
    %63 = arith.subf %59, %62 : vector<16x16xf32>
    %64 = math.exp %63 : vector<16x16xf32>
    %cst_25 = arith.constant dense<0.000000e+00> : vector<16xf32>
    %65 = vector.multi_reduction <add>, %64, %cst_25 [1] : vector<16x16xf32> to vector<16xf32>
    %66 = vector.shape_cast %65 : vector<16xf32> to vector<16x1xf32>
    %67 = tpu.reciprocal %66 {approx = true} : vector<16x1xf32> -> vector<16x1xf32>
    %68 = arith.mulf %66, %67 : vector<16x1xf32>
    %cst_26 = arith.constant 2.000000e+00 : f32
    %69 = vector.broadcast %cst_26 : f32 to vector<16x1xf32>
    %70 = arith.subf %69, %68 : vector<16x1xf32>
    %71 = arith.mulf %67, %70 : vector<16x1xf32>
    %72 = vector.broadcast %71 : vector<16x1xf32> to vector<16x16xf32>
    %73 = arith.mulf %64, %72 : vector<16x16xf32>
    %cst_27 = arith.constant dense<0.000000e+00> : vector<16x8xf32>
    %74 = tpu.matmul %73, %55, %cst_27 {dimension_numbers = #tpu.dot_dimension_numbers<[1], [0], [0], [1], [0, 0, 1, 1], [], []>} : vector<16x16xf32>, vector<16x8xf32>, vector<16x8xf32> -> vector<16x8xf32>
    %c0_28 = arith.constant 0 : index
    %c16 = arith.constant 16 : index
    %75 = vector.load %arg16[%c0_28, %c16] : memref<16x32xf32, #tpu.memory_space<vmem>>, vector<16x8xf32>
    tpu.vector_store %arg16[%c0_28, %c16], %74 {strides = array<i32>} : memref<16x32xf32, #tpu.memory_space<vmem>>, vector<16x8xf32>,
    %76 = vector.extract_strided_slice %6 {offsets = [0, 24], sizes = [16, 8], strides = [1, 1]} : vector<16x96xf32> to vector<16x8xf32>
    %77 = vector.extract_strided_slice %6 {offsets = [0, 56], sizes = [16, 8], strides = [1, 1]} : vector<16x96xf32> to vector<16x8xf32>
    %78 = vector.extract_strided_slice %6 {offsets = [0, 88], sizes = [16, 8], strides = [1, 1]} : vector<16x96xf32> to vector<16x8xf32>
    %cst_29 = arith.constant dense<0.000000e+00> : vector<16x16xf32>
    %79 = tpu.matmul %76, %77, %cst_29 {dimension_numbers = #tpu.dot_dimension_numbers<[1], [1], [0], [0], [0, 0, 1, 0], [], []>} : vector<16x8xf32>, vector<16x8xf32>, vector<16x16xf32> -> vector<16x16xf32>
    %cst_30 = arith.constant 0.353553385 : f32
    %80 = vector.broadcast %cst_30 : f32 to vector<16x16xf32>
    %81 = arith.mulf %79, %80 : vector<16x16xf32>
    %82 = arith.addf %81, %1 : vector<16x16xf32>
    %cst_31 = arith.constant dense<0xFF800000> : vector<16xf32>
    %83 = vector.multi_reduction <maximumf>, %82, %cst_31 [1] : vector<16x16xf32> to vector<16xf32>
    %84 = vector.shape_cast %83 : vector<16xf32> to vector<16x1xf32>
    %85 = vector.broadcast %84 : vector<16x1xf32> to vector<16x16xf32>
    %86 = arith.subf %82, %85 : vector<16x16xf32>
    %87 = math.exp %86 : vector<16x16xf32>
    %cst_32 = arith.constant dense<0.000000e+00> : vector<16xf32>
    %88 = vector.multi_reduction <add>, %87, %cst_32 [1] : vector<16x16xf32> to vector<16xf32>
    %89 = vector.shape_cast %88 : vector<16xf32> to vector<16x1xf32>
    %90 = tpu.reciprocal %89 {approx = true} : vector<16x1xf32> -> vector<16x1xf32>
    %91 = arith.mulf %89, %90 : vector<16x1xf32>
    %cst_33 = arith.constant 2.000000e+00 : f32
    %92 = vector.broadcast %cst_33 : f32 to vector<16x1xf32>
    %93 = arith.subf %92, %91 : vector<16x1xf32>
    %94 = arith.mulf %90, %93 : vector<16x1xf32>
    %95 = vector.broadcast %94 : vector<16x1xf32> to vector<16x16xf32>
    %96 = arith.mulf %87, %95 : vector<16x16xf32>
    %cst_34 = arith.constant dense<0.000000e+00> : vector<16x8xf32>
    %97 = tpu.matmul %96, %78, %cst_34 {dimension_numbers = #tpu.dot_dimension_numbers<[1], [0], [0], [1], [0, 0, 1, 1], [], []>} : vector<16x16xf32>, vector<16x8xf32>, vector<16x8xf32> -> vector<16x8xf32>
    %c0_35 = arith.constant 0 : index
    %c24 = arith.constant 24 : index
    %98 = vector.load %arg16[%c0_35, %c24] : memref<16x32xf32, #tpu.memory_space<vmem>>, vector<16x8xf32>
    tpu.vector_store %arg16[%c0_35, %c24], %97 {strides = array<i32>} : memref<16x32xf32, #tpu.memory_space<vmem>>, vector<16x8xf32>,
    %c0_36 = arith.constant 0 : index
    %c0_37 = arith.constant 0 : index
    %99 = vector.load %arg16[%c0_36, %c0_37] : memref<16x32xf32, #tpu.memory_space<vmem>>, vector<16x32xf32>
    %c0_38 = arith.constant 0 : index
    %c0_39 = arith.constant 0 : index
    %100 = vector.load %arg5[%c0_38, %c0_39] : memref<32x32xf32, #tpu.memory_space<vmem>>, vector<32x32xf32>
    %cst_40 = arith.constant dense<0.000000e+00> : vector<16x32xf32>
    %101 = tpu.matmul %99, %100, %cst_40 {dimension_numbers = #tpu.dot_dimension_numbers<[1], [0], [0], [1], [0, 0, 1, 1], [], []>} : vector<16x32xf32>, vector<32x32xf32>, vector<16x32xf32> -> vector<16x32xf32>
    %c0_41 = arith.constant 0 : index
    %c0_42 = arith.constant 0 : index
    %102 = vector.load %arg6[%c0_41, %c0_42] : memref<1x32xf32, #tpu.memory_space<vmem>>, vector<1x32xf32>
    %103 = vector.broadcast %102 : vector<1x32xf32> to vector<16x32xf32>
    %104 = arith.addf %101, %103 : vector<16x32xf32>
    %105 = arith.addf %0, %104 : vector<16x32xf32>
    %c0_43 = arith.constant 0 : index
    %c0_44 = arith.constant 0 : index
    %106 = vector.load %arg7[%c0_43, %c0_44] : memref<1x32xf32, #tpu.memory_space<vmem>>, vector<1x32xf32>
    %c0_45 = arith.constant 0 : index
    %c0_46 = arith.constant 0 : index
    %107 = vector.load %arg8[%c0_45, %c0_46] : memref<1x32xf32, #tpu.memory_space<vmem>>, vector<1x32xf32>
    %cst_47 = arith.constant dense<0.000000e+00> : vector<16xf32>
    %108 = vector.multi_reduction <add>, %105, %cst_47 [1] : vector<16x32xf32> to vector<16xf32>
    %109 = vector.shape_cast %108 : vector<16xf32> to vector<16x1xf32>
    %cst_48 = arith.constant 3.200000e+01 : f32
    %110 = vector.broadcast %cst_48 : f32 to vector<16x1xf32>
    %111 = arith.divf %109, %110 : vector<16x1xf32>
    %112 = vector.broadcast %111 : vector<16x1xf32> to vector<16x32xf32>
    %113 = arith.subf %105, %112 : vector<16x32xf32>
    %114 = arith.mulf %113, %113 : vector<16x32xf32>
    %cst_49 = arith.constant dense<0.000000e+00> : vector<16xf32>
    %115 = vector.multi_reduction <add>, %114, %cst_49 [1] : vector<16x32xf32> to vector<16xf32>
    %116 = vector.shape_cast %115 : vector<16xf32> to vector<16x1xf32>
    %cst_50 = arith.constant 3.200000e+01 : f32
    %117 = vector.broadcast %cst_50 : f32 to vector<16x1xf32>
    %118 = arith.divf %116, %117 : vector<16x1xf32>
    %119 = vector.broadcast %111 : vector<16x1xf32> to vector<16x32xf32>
    %120 = arith.subf %105, %119 : vector<16x32xf32>
    %cst_51 = arith.constant 9.99999974E-6 : f32
    %121 = vector.broadcast %cst_51 : f32 to vector<16x1xf32>
    %122 = arith.addf %118, %121 : vector<16x1xf32>
    %123 = math.rsqrt %122 : vector<16x1xf32>
    %124 = vector.broadcast %123 : vector<16x1xf32> to vector<16x32xf32>
    %125 = arith.mulf %120, %124 : vector<16x32xf32>
    %126 = vector.broadcast %106 : vector<1x32xf32> to vector<16x32xf32>
    %127 = arith.mulf %125, %126 : vector<16x32xf32>
    %128 = vector.broadcast %107 : vector<1x32xf32> to vector<16x32xf32>
    %129 = arith.addf %127, %128 : vector<16x32xf32>
    %c0_52 = arith.constant 0 : index
    %c0_53 = arith.constant 0 : index
    %130 = vector.load %arg9[%c0_52, %c0_53] : memref<32x64xf32, #tpu.memory_space<vmem>>, vector<32x64xf32>
    %cst_54 = arith.constant dense<0.000000e+00> : vector<16x64xf32>
    %131 = tpu.matmul %129, %130, %cst_54 {dimension_numbers = #tpu.dot_dimension_numbers<[1], [0], [0], [1], [0, 0, 1, 1], [], []>} : vector<16x32xf32>, vector<32x64xf32>, vector<16x64xf32> -> vector<16x64xf32>
    %c0_55 = arith.constant 0 : index
    %c0_56 = arith.constant 0 : index
    %132 = vector.load %arg10[%c0_55, %c0_56] : memref<1x64xf32, #tpu.memory_space<vmem>>, vector<1x64xf32>
    %133 = vector.broadcast %132 : vector<1x64xf32> to vector<16x64xf32>
    %134 = arith.addf %131, %133 : vector<16x64xf32>
    %cst_57 = arith.constant 0.000000e+00 : f32
    %135 = vector.broadcast %cst_57 : f32 to vector<16x64xf32>
    %136 = arith.maximumf %134, %135 : vector<16x64xf32>
    %c0_58 = arith.constant 0 : index
    %c0_59 = arith.constant 0 : index
    %137 = vector.load %arg11[%c0_58, %c0_59] : memref<64x32xf32, #tpu.memory_space<vmem>>, vector<64x32xf32>
    %cst_60 = arith.constant dense<0.000000e+00> : vector<16x32xf32>
    %138 = tpu.matmul %136, %137, %cst_60 {dimension_numbers = #tpu.dot_dimension_numbers<[1], [0], [0], [1], [0, 0, 1, 1], [], []>} : vector<16x64xf32>, vector<64x32xf32>, vector<16x32xf32> -> vector<16x32xf32>
    %c0_61 = arith.constant 0 : index
    %c0_62 = arith.constant 0 : index
    %139 = vector.load %arg12[%c0_61, %c0_62] : memref<1x32xf32, #tpu.memory_space<vmem>>, vector<1x32xf32>
    %140 = vector.broadcast %139 : vector<1x32xf32> to vector<16x32xf32>
    %141 = arith.addf %138, %140 : vector<16x32xf32>
    %142 = arith.addf %129, %141 : vector<16x32xf32>
    %c0_63 = arith.constant 0 : index
    %c0_64 = arith.constant 0 : index
    %143 = vector.load %arg13[%c0_63, %c0_64] : memref<1x32xf32, #tpu.memory_space<vmem>>, vector<1x32xf32>
    %c0_65 = arith.constant 0 : index
    %c0_66 = arith.constant 0 : index
    %144 = vector.load %arg14[%c0_65, %c0_66] : memref<1x32xf32, #tpu.memory_space<vmem>>, vector<1x32xf32>
    %cst_67 = arith.constant dense<0.000000e+00> : vector<16xf32>
    %145 = vector.multi_reduction <add>, %142, %cst_67 [1] : vector<16x32xf32> to vector<16xf32>
    %146 = vector.shape_cast %145 : vector<16xf32> to vector<16x1xf32>
    %cst_68 = arith.constant 3.200000e+01 : f32
    %147 = vector.broadcast %cst_68 : f32 to vector<16x1xf32>
    %148 = arith.divf %146, %147 : vector<16x1xf32>
    %149 = vector.broadcast %148 : vector<16x1xf32> to vector<16x32xf32>
    %150 = arith.subf %142, %149 : vector<16x32xf32>
    %151 = arith.mulf %150, %150 : vector<16x32xf32>
    %cst_69 = arith.constant dense<0.000000e+00> : vector<16xf32>
    %152 = vector.multi_reduction <add>, %151, %cst_69 [1] : vector<16x32xf32> to vector<16xf32>
    %153 = vector.shape_cast %152 : vector<16xf32> to vector<16x1xf32>
    %cst_70 = arith.constant 3.200000e+01 : f32
    %154 = vector.broadcast %cst_70 : f32 to vector<16x1xf32>
    %155 = arith.divf %153, %154 : vector<16x1xf32>
    %156 = vector.broadcast %148 : vector<16x1xf32> to vector<16x32xf32>
    %157 = arith.subf %142, %156 : vector<16x32xf32>
    %cst_71 = arith.constant 9.99999974E-6 : f32
    %158 = vector.broadcast %cst_71 : f32 to vector<16x1xf32>
    %159 = arith.addf %155, %158 : vector<16x1xf32>
    %160 = math.rsqrt %159 : vector<16x1xf32>
    %161 = vector.broadcast %160 : vector<16x1xf32> to vector<16x32xf32>
    %162 = arith.mulf %157, %161 : vector<16x32xf32>
    %163 = vector.broadcast %143 : vector<1x32xf32> to vector<16x32xf32>
    %164 = arith.mulf %162, %163 : vector<16x32xf32>
    %165 = vector.broadcast %144 : vector<1x32xf32> to vector<16x32xf32>
    %166 = arith.addf %164, %165 : vector<16x32xf32>
    %c0_72 = arith.constant 0 : index
    %c0_73 = arith.constant 0 : index
    %167 = vector.load %arg15[%c0_72, %c0_73] : memref<16x32xf32, #tpu.memory_space<vmem>>, vector<16x32xf32>
    tpu.vector_store %arg15[%c0_72, %c0_73], %166 {strides = array<i32>} : memref<16x32xf32, #tpu.memory_space<vmem>>, vector<16x32xf32>,
    return
  }
  func.func @transform_0(%arg0: i32) -> (i32, i32) {
    %c0_i32 = arith.constant 0 : i32
    %c0_i32_0 = arith.constant 0 : i32
    %c0_i32_1 = arith.constant 0 : i32
    return %c0_i32, %c0_i32_0 : i32, i32
  }
  func.func @transform_1(%arg0: i32) -> (i32, i32) {
    %c0_i32 = arith.constant 0 : i32
    %c0_i32_0 = arith.constant 0 : i32
    %c0_i32_1 = arith.constant 0 : i32
    return %c0_i32, %c0_i32_0 : i32, i32
  }
  func.func @transform_2(%arg0: i32) -> (i32, i32) {
    %c0_i32 = arith.constant 0 : i32
    %c0_i32_0 = arith.constant 0 : i32
    %c0_i32_1 = arith.constant 0 : i32
    return %c0_i32, %c0_i32_0 : i32, i32
  }
  func.func @transform_3(%arg0: i32) -> (i32, i32) {
    %c0_i32 = arith.constant 0 : i32
    %c0_i32_0 = arith.constant 0 : i32
    %c0_i32_1 = arith.constant 0 : i32
    return %c0_i32, %c0_i32_0 : i32, i32
  }
  func.func @transform_4(%arg0: i32) -> (i32, i32) {
    %c0_i32 = arith.constant 0 : i32
    %c0_i32_0 = arith.constant 0 : i32
    %c0_i32_1 = arith.constant 0 : i32
    return %c0_i32, %c0_i32_0 : i32, i32
  }
  func.func @transform_5(%arg0: i32) -> (i32, i32) {
    %c0_i32 = arith.constant 0 : i32
    %c0_i32_0 = arith.constant 0 : i32
    %c0_i32_1 = arith.constant 0 : i32
    return %c0_i32, %c0_i32_0 : i32, i32
  }
  func.func @transform_6(%arg0: i32) -> (i32, i32) {
    %c0_i32 = arith.constant 0 : i32
    %c0_i32_0 = arith.constant 0 : i32
    %c0_i32_1 = arith.constant 0 : i32
    return %c0_i32, %c0_i32_0 : i32, i32
  }
  func.func @transform_7(%arg0: i32) -> (i32, i32) {
    %c0_i32 = arith.constant 0 : i32
    %c0_i32_0 = arith.constant 0 : i32
    %c0_i32_1 = arith.constant 0 : i32
    return %c0_i32, %c0_i32_0 : i32, i32
  }
  func.func @transform_8(%arg0: i32) -> (i32, i32) {
    %c0_i32 = arith.constant 0 : i32
    %c0_i32_0 = arith.constant 0 : i32
    %c0_i32_1 = arith.constant 0 : i32
    return %c0_i32, %c0_i32_0 : i32, i32
  }
  func.func @transform_9(%arg0: i32) -> (i32, i32) {
    %c0_i32 = arith.constant 0 : i32
    %c0_i32_0 = arith.constant 0 : i32
    %c0_i32_1 = arith.constant 0 : i32
    return %c0_i32, %c0_i32_0 : i32, i32
  }
  func.func @transform_10(%arg0: i32) -> (i32, i32) {
    %c0_i32 = arith.constant 0 : i32
    %c0_i32_0 = arith.constant 0 : i32
    %c0_i32_1 = arith.constant 0 : i32
    return %c0_i32, %c0_i32_0 : i32, i32
  }
  func.func @transform_11(%arg0: i32) -> (i32, i32) {
    %c0_i32 = arith.constant 0 : i32
    %c0_i32_0 = arith.constant 0 : i32
    %c0_i32_1 = arith.constant 0 : i32
    return %c0_i32, %c0_i32_0 : i32, i32
  }
  func.func @transform_12(%arg0: i32) -> (i32, i32) {
    %c0_i32 = arith.constant 0 : i32
    %c0_i32_0 = arith.constant 0 : i32
    %c0_i32_1 = arith.constant 0 : i32
    return %c0_i32, %c0_i32_0 : i32, i32
  }
  func.func @transform_13(%arg0: i32) -> (i32, i32) {
    %c0_i32 = arith.constant 0 : i32
    %c0_i32_0 = arith.constant 0 : i32
    %c0_i32_1 = arith.constant 0 : i32
    return %c0_i32, %c0_i32_0 : i32, i32
  }
  func.func @transform_14(%arg0: i32) -> (i32, i32) {
    %c0_i32 = arith.constant 0 : i32
    %c0_i32_0 = arith.constant 0 : i32
    %c0_i32_1 = arith.constant 0 : i32
    return %c0_i32, %c0_i32_0 : i32, i32
  }
}

</mosaic_0001>

<bundles_post_ra>
// kernel: tpu_custom_call.1
= control target key start
LH: loop header
LB: loop body
LE: loop exit
PB: predicated region body
PF: predicated region fallthrough
CT: control target
= control target key end

     0   :  { %19 = vsyncpa [#allocation4], 0  ;;  %s2101_s0 = inlined_call_operand.hbm [shape: f32[16,32], index: 0, kind: input, shape index: {}]   ;;  %s2102_s1 = inlined_call_operand.hbm [shape: f32[16,16], index: 1, kind: input, shape index: {}]   ;;  %s2103_s2 = inlined_call_operand.vmem [shape: f32[32,96], index: 2, kind: input, shape index: {}]   ;;  %s2104_s3 = inlined_call_operand.vmem [shape: f32[1,96], index: 3, kind: input, shape index: {}]   ;;  %s2105_s4 = inlined_call_operand.vmem [shape: f32[32,32], index: 4, kind: input, shape index: {}]   ;;  %s2106_s5 = inlined_call_operand.vmem [shape: f32[1,32], index: 5, kind: input, shape index: {}]   ;;  %s2107_s6 = inlined_call_operand.vmem [shape: f32[1,32], index: 6, kind: input, shape index: {}]   ;;  %s2108_s7 = inlined_call_operand.vmem [shape: f32[1,32], index: 7, kind: input, shape index: {}]   ;;  %s2109_s8 = inlined_call_operand.vmem [shape: f32[32,64], index: 8, kind: input, shape index: {}]   ;;  %s2110_s9 = inlined_call_operand.vmem [shape: f32[1,64], index: 9, kind: input, shape index: {}]   ;;  %s2111_s10 = inlined_call_operand.vmem [shape: f32[64,32], index: 10, kind: input, shape index: {}]   ;;  %s2112_s11 = inlined_call_operand.vmem [shape: f32[1,32], index: 11, kind: input, shape index: {}]   ;;  %s2113_s12 = inlined_call_operand.vmem [shape: f32[1,32], index: 12, kind: input, shape index: {}]   ;;  %s2114_s13 = inlined_call_operand.vmem [shape: f32[1,32], index: 13, kind: input, shape index: {}]   ;;  %s2115_s14 = inlined_call_operand.hbm [shape: f32[16,32], index: 14, kind: output, shape index: {}]  }
   0x1   :  { %20 = vsyncpa [#allocation7], 0 }
   0x2   :  { %21 = vsyncpa [#allocation5], 0  ;;  %s1778_s29 = smov [#allocation3]  }
   0x3   :  { %s27_s30 = sshll.u32 %s1778_s29, 4  ;;  %s28_s30 = int_to_ptr.vmem [resolvable:$true] %s27_s30 }
   0x4   :  { %s1720_s15 = scalar_lea.vmem %s28_s30, 256  ;;  %p1725_p1 = scmp.lt.s32.totalorder %s28_s30, %s28_s30 }
   0x5   :  { %p1721_p0 = scmp.ne.s32.totalorder %s28_s30, %s1720_s15  ;;  %p1726_p2 = scmp.lt.s32.totalorder %s1720_s15, %s1720_s15 }
   0x7   :  { %p1727_p3 = por %p1726_p2, %p1725_p1 }
   0x9   :  { %p1728_p4 = pnand %p1727_p3, %p1721_p0 }
   0xb   :  { %1731 = shalt.err (!%p1728_p4)
}
   0xc   :  { %s1779_s16 = smov 128   ;;  %s1780_s17 = smov 8  }
   0xd   :  { %33 = dma.hbm_to_vmem [thread:$0]  %s2101_s0, 256, %s28_s30, [#allocation4], %s1779_s16, %s1779_s16, %s1780_s17  }
   0xe   :  { %s1781_s20 = smov [#allocation6]  }
   0xf   :  { %s39_s21 = sshll.u32 %s1781_s20, 4  ;;  %s40_s21 = int_to_ptr.vmem [resolvable:$true] %s39_s21 }
  0x10   :  { %s1740_s22 = scalar_lea.vmem %s40_s21, 256  ;;  %p1745_p6 = scmp.lt.s32.totalorder %s40_s21, %s40_s21 }
  0x11   :  { %p1741_p5 = scmp.ne.s32.totalorder %s40_s21, %s1740_s22  ;;  %p1746_p7 = scmp.lt.s32.totalorder %s1740_s22, %s1740_s22 }
  0x13   :  { %p1747_p8 = por %p1746_p7, %p1745_p6 }
  0x15   :  { %p1748_p9 = pnand %p1747_p8, %p1741_p5 }
  0x17   :  { %1751 = shalt.err (!%p1748_p9)
}
  0x18   :  { %45 = dma.hbm_to_vmem [thread:$0]  %s2102_s1, 256, %s40_s21, [#allocation7], %s1779_s16, %s1779_s16, %s1780_s17  }
  0x19   :  { %1772 = dma.done.wait [#allocation4], 256  }
  0x1a   :  { %1773 = vsyncadd [#allocation4], 4294967040 }
  0x1b   :  { %1774 = dma.done.wait [#allocation7], 256  }
  0x1c   :  { %1775 = vsyncadd [#allocation7], 4294967040  ;;  %vm91_vm0 = vcmask 261120   ;;  %v83_v0 = vld [vmem:[%s2103_s2 + $0x18] sm:$0xff]  ;;  %v82_v1 = vld [vmem:[%s2103_s2 + $0x10] sm:$0xff]  ;;  %vm179_vm1 = vcmask 64512  }
  0x1d   :  { %1546 = vmatprep.subr.mxu1 %v83_v0  ;;  %v1889_v2 = vld [vmem:[#allocation3] sm:$0xff]  ;;  %v81_v3 = vld [vmem:[%s2103_s2 + $0x8] sm:$0xff]  ;;  %v80_v4 = vld [vmem:[%s2103_s2] sm:$0xff]  ;;  %s1782_s2 = smov 88   ;;  %s1783_s19 = smov 96   ;;  %vm267_vm2 = vcmask 130048  }
  0x1e   :  { %1547 = vmatpush3.msra.mxu1 %v83_v0  ;;  %1554 = vmatprep.mubr.msk.f32.mxu1 %vm91_vm0, %v1889_v2  ;;  %v1899_v5 = vld [vmem:[#allocation3 + $0x8] sm:$0xff]  ;;  %v1446_v6 = vld [vmem:[%s2104_s3] ss:$0 sm:$0xff]  ;;  %s1784_s3 = smov 120   ;;  %v1930_v18 = vld [vmem:[#allocation6 + $0x8] sm:$0xff]  ;;  %s1785_s20 = smov 64  }
  0x1f   :  { %1548 = vmatprep.subr.mxu1 %v82_v1  ;;  %v1932_v21 = vld [vmem:[#allocation6] sm:$0xff]  ;;  %s1786_s21 = smov 56   ;;  %s1787_s22 = smov 80   ;;  %vm603_vm3 = vcmask 130112   ;;  %vm824_vm4 = vcmask 195712   ;;  %vm1045_vm5 = vcmask 261312  }
  0x20   :  { %1549 = vmatpush3.msra.mxu1 %v82_v1  ;;  %s1788_s23 = smov 112   ;;  %s1789_s24 = smov 48   ;;  %vm1298_vm6 = vcmask 523264  }
  0x21   :  { %1550 = vmatprep.subr.mxu1 %v81_v3  ;;  %s1790_s0 = smov 72   ;;  %s1791_s25 = smov 104  }
  0x22   :  { %1551 = vmatpush3.msra.mxu1 %v81_v3  ;;  %s1792_s26 = smov 40   ;;  %s1793_s27 = smov 16  }
  0x23   :  { %1552 = vmatprep.subr.mxu1 %v80_v4  ;;  %s1795_s29 = smov [#allocation8]  }
  0x24   :  { %1553 = vmatpush3.msra.mxu1 %v80_v4  ;;  %s1433_s1 = sshll.u32 %s1795_s29, 4  ;;  %s1434_s1 = int_to_ptr.vmem [resolvable:$true] %s1433_s1 }
  0x25   :  { %1555 = vmatmul.mubr.msk.f32.vlgmr.msra.gmra.mxu1 %vm91_vm0, %v1899_v5  ;;  %s1752_s30 = scalar_lea.vmem %s1434_s1, 256  ;;  %p1757_p11 = scmp.lt.s32.totalorder %s1434_s1, %s1434_s1 }
  0x26   :  { %p1753_p10 = scmp.ne.s32.totalorder %s1434_s1, %s1752_s30  ;;  %p1758_p12 = scmp.lt.s32.totalorder %s1752_s30, %s1752_s30 }
  0x28   :  { %p1759_p13 = por %p1758_p12, %p1757_p11 }
  0x2a   :  { %p1760_p0 = pnand %p1759_p13, %p1753_p10 }
  0xe5   :  { %v1556_v7 = vpop.f32.mrf.mxu1 }
  0xe6   :  { %v1906_v8 = vadd.f32 %v1556_v7, %v1446_v6 }
  0xe7   :  { %v164_v9 = vpop.f32.mrf.mxu1 }
  0xe8   :  { %v1908_v10 = vadd.f32 %v1446_v6, %v164_v9  ;;  %391 = vrot.lane.b32.xlu1 %v1906_v8, %s1782_s2  ;;  %177 = vrot.lane.b32.xlu0 %v1906_v8, %s1783_s19 }
  0xea   :  { %1561 = vmatprep.mubr.msk.f32.mxu1 %vm179_vm1, %v1908_v10 }
  0xec   :  { %389 = vrot.lane.b32.xlu1 %v1908_v10, %s1782_s2  ;;  %175 = vrot.lane.b32.xlu0 %v1908_v10, %s1783_s19 }
  0xf0   :  { %387 = vrot.lane.b32.xlu1 %v1906_v8, %s1784_s3  ;;  %385 = vrot.lane.b32.xlu0 %v1908_v10, %s1784_s3  ;;  %s1794_s3 = smov 24  }
 0x15a   :  { %v178_v11 = vpop.permute.xlu0 %177  ;;  %v392_v12 = vpop.permute.xlu1 %391 }
 0x15b   :  { %1557 = vmatprep.subr.msk.mxu1 %vm179_vm1, %v178_v11 }
 0x15c   :  { %1558 = vmatpush3.xpose.msk.msra.mxu1 %vm179_vm1, %v178_v11 }
 0x15e   :  { %v176_v13 = vpop.permute.xlu0 %175  ;;  %v390_v15 = vpop.permute.xlu1 %389 }
 0x15f   :  { %1559 = vmatprep.subr.msk.mxu1 %vm179_vm1, %v176_v13 }
 0x160   :  { %1560 = vmatpush3.xpose.msk.msra.mxu1 %vm179_vm1, %v176_v13 }
 0x161   :  { %1571 = vmatprep.subr.msk.mxu1 %vm179_vm1, %v392_v12 }
 0x162   :  { %v386_v14 = vpop.permute.xlu0 %385  ;;  %v388_v16 = vpop.permute.xlu1 %387 }
 0x163   :  { %1562 = vmatmul.mubr.msk.f32.vlgmr.msra.gmra.mxu1 %vm179_vm1, %v1906_v8 }
 0x164   :  { %1572 = vmatpush3.xpose.msk.msra.mxu1 %vm179_vm1, %v392_v12  ;;  %1575 = vmatprep.mubr.msk.f32.mxu1 %vm179_vm1, %v386_v14 }
 0x165   :  { %1573 = vmatprep.subr.msk.mxu1 %vm179_vm1, %v390_v15 }
 0x168   :  { %1574 = vmatpush3.xpose.msk.msra.mxu1 %vm179_vm1, %v390_v15 }
 0x16b   :  { %1576 = vmatmul.mubr.msk.f32.vlgmr.msra.gmra.mxu1 %vm179_vm1, %v388_v16 }
 0x223   :  { %v1563_v17 = vpop.f32.mrf.mxu1 }
 0x224   :  { %v264_v19 = vmul.f32 0.35355338, %v1563_v17 }
 0x225   :  { %v254_v20 = vpop.f32.mrf.mxu1 }
 0x226   :  { %v263_v22 = vmul.f32 0.35355338, %v254_v20  ;;  %v266_v23 = vadd.f32 %v264_v19, %v1930_v18 }
 0x228   :  { %v271_v24 = vsel %vm267_vm2, %v266_v23, -inf  ;;  %v265_v25 = vadd.f32 %v263_v22, %v1932_v21 }
 0x229   :  { %272 = vmax.xlane.f32.xlu1 %v271_v24 }
 0x22a   :  { %v268_v26 = vsel %vm267_vm2, %v265_v25, -inf }
 0x22b   :  { %v1577_v27 = vpop.f32.mrf.mxu1  ;;  %269 = vmax.xlane.f32.xlu0 %v268_v26 }
 0x22c   :  { %v477_v29 = vmul.f32 0.35355338, %v1577_v27 }
 0x22d   :  { %v467_v28 = vpop.f32.mrf.mxu1 }
 0x22e   :  { %v476_v30 = vmul.f32 0.35355338, %v467_v28  ;;  %v479_v33 = vadd.f32 %v477_v29, %v1930_v18 }
 0x230   :  { %v478_v31 = vadd.f32 %v476_v30, %v1932_v21  ;;  %v483_v34 = vsel %vm267_vm2, %v479_v33, -inf }
 0x232   :  { %v480_v32 = vsel %vm267_vm2, %v478_v31, -inf }
 0x233   :  { %481 = vmax.xlane.f32.xlu0 %v480_v32 }
 0x237   :  { %484 = vmax.xlane.f32.xlu0 %v483_v34 }
 0x23a   :  { %298 = vrot.lane.b32.xlu1 %v1906_v8, %s1785_s20 }
 0x2b2   :  { %v273_v35 = vpop.xlane.xlu1 %272 }
 0x2b3   :  { %v275_v36 = vsub.f32 %v266_v23, %v273_v35 }
 0x2b4   :  { %v270_v37 = vpop.xlane.xlu0 %269 }
 0x2b5   :  { %v278_v38 = vmul.f32 1.442695, %v275_v36  ;;  %v274_v39 = vsub.f32 %v265_v25, %v270_v37 }
 0x2b6   :  { %v299_v40 = vpop.permute.xlu1 %298 }
 0x2b7   :  { %1672 = vpow2.f32 %v278_v38  ;;  %v276_v41 = vmul.f32 1.442695, %v274_v39  ;;  %1564 = vmatprep.subr.mxu0 %v299_v40 }
 0x2b8   :  { %1565 = vmatpush3.msra.mxu0 %v299_v40 }
 0x2b9   :  { %1674 = vpow2.f32 %v276_v41 }
 0x2bc   :  { %v482_v42 = vpop.xlane.xlu0 %481 }
 0x2bd   :  { %v486_v52 = vsub.f32 %v478_v31, %v482_v42 }
 0x2bf   :  { %v488_v53 = vmul.f32 1.442695, %v486_v52 }
 0x2c0   :  { %v485_v43 = vpop.xlane.xlu0 %484 }
 0x2c1   :  { %v487_v44 = vsub.f32 %v479_v33, %v485_v43 }
 0x2c3   :  { %v490_v45 = vmul.f32 1.442695, %v487_v44 }
 0x2c4   :  { %v1673_v46 = vpop.eup %1672 }
 0x2c5   :  { %1676 = vpow2.f32 %v490_v45  ;;  %v283_v47 = vsel %vm267_vm2, %v1673_v46, 0.0 }
 0x2c6   :  { %v1675_v48 = vpop.eup %1674  ;;  %284 = vadd.xlane.f32.xlu0 %v283_v47  ;;  %1678 = vpow2.f32 %v488_v53 }
 0x2c7   :  { %v280_v49 = vsel %vm267_vm2, %v1675_v48, 0.0 }
 0x2c8   :  { %281 = vadd.xlane.f32.xlu1 %v280_v49 }
 0x2d2   :  { %v1677_v50 = vpop.eup %1676 }
 0x2d3   :  { %v495_v51 = vsel %vm267_vm2, %v1677_v50, 0.0  ;;  %v1679_v54 = vpop.eup %1678 }
 0x2d4   :  { %496 = vadd.xlane.f32.xlu0 %v495_v51  ;;  %v492_v55 = vsel %vm267_vm2, %v1679_v54, 0.0 }
 0x2d9   :  { %510 = vrot.lane.b32.xlu1 %v1906_v8, %s1786_s21 }
 0x2ea   :  { %296 = vrot.lane.b32.xlu0 %v1908_v10, %s1785_s20 }
 0x2ee   :  { %612 = vrot.lane.b32.xlu0 %v1906_v8, %s1787_s22 }
 0x2f2   :  { %606 = vrot.lane.b32.xlu0 %v1908_v10, %s1788_s23 }
 0x2fd   :  { %493 = vadd.xlane.f32.xlu1 %v492_v55 }
 0x30e   :  { %508 = vrot.lane.b32.xlu1 %v1908_v10, %s1786_s21 }
 0x312   :  { %610 = vrot.lane.b32.xlu1 %v1908_v10, %s1787_s22 }
 0x316   :  { %608 = vrot.lane.b32.xlu1 %v1906_v8, %s1788_s23 }
 0x34f   :  { %v285_v56 = vpop.xlane.xlu0 %284 }
 0x350   :  { %1680 = vrcp.f32 %v285_v56 }
 0x351   :  { %v282_v57 = vpop.xlane.xlu1 %281 }
 0x352   :  { %1682 = vrcp.f32 %v282_v57 }
 0x355   :  { %v511_v4 = vpop.permute.xlu1 %510 }
 0x35d   :  { %v1681_v58 = vpop.eup %1680  ;;  %v497_v59 = vpop.xlane.xlu0 %496 }
 0x35e   :  { %v289_v60 = vmul.f32 %v1681_v58, %v285_v56  ;;  %1684 = vrcp.f32 %v497_v59 }
 0x35f   :  { %v1683_v61 = vpop.eup %1682 }
 0x360   :  { %v291_v62 = vsub.f32 2.0, %v289_v60  ;;  %v288_v63 = vmul.f32 %v1683_v61, %v282_v57 }
 0x361   :  { %v297_v0 = vpop.permute.xlu0 %296 }
 0x362   :  { %v290_v1 = vsub.f32 2.0, %v288_v63  ;;  %1566 = vmatprep.subr.mxu0 %v297_v0  ;;  %v293_v3 = vmul.f32 %v1681_v58, %v291_v62 }
 0x363   :  { %1567 = vmatpush3.msra.mxu0 %v297_v0 }
 0x364   :  { %1578 = vmatprep.subr.mxu0 %v511_v4  ;;  %v292_v6 = vmul.f32 %v1683_v61, %v290_v1  ;;  %v295_v9 = vmul.f32 %v1673_v46, %v293_v3 }
 0x365   :  { %v613_v13 = vpop.permute.xlu0 %612 }
 0x366   :  { %v294_v7 = vmul.f32 %v1675_v48, %v292_v6 }
 0x368   :  { %1568 = vmatprep.mubr.msk.f32.mxu0 %vm267_vm2, %v294_v7 }
 0x369   :  { %1569 = vmatmul.mubr.msk.f32.vlgmr.msra.gmra.mxu0 %vm267_vm2, %v295_v9  ;;  %v607_v26 = vpop.permute.xlu0 %606 }
 0x36a   :  { %1579 = vmatpush3.msra.mxu0 %v511_v4 }
 0x36b   :  { %v1685_v14 = vpop.eup %1684 }
 0x36c   :  { %v501_v15 = vmul.f32 %v1685_v14, %v497_v59 }
 0x36e   :  { %v503_v17 = vsub.f32 2.0, %v501_v15 }
 0x370   :  { %v505_v22 = vmul.f32 %v1685_v14, %v503_v17 }
 0x372   :  { %v507_v25 = vmul.f32 %v1677_v50, %v505_v22 }
 0x386   :  { %v494_v11 = vpop.xlane.xlu1 %493 }
 0x387   :  { %1686 = vrcp.f32 %v494_v11 }
 0x38a   :  { %v509_v12 = vpop.permute.xlu1 %508 }
 0x38b   :  { %1580 = vmatprep.subr.mxu0 %v509_v12 }
 0x38c   :  { %1581 = vmatpush3.msra.mxu0 %v509_v12 }
 0x38d   :  { %1585 = vmatprep.subr.msk.mxu0 %vm179_vm1, %v613_v13 }
 0x38e   :  { %v611_v27 = vpop.permute.xlu1 %610 }
 0x392   :  { %v609_v28 = vpop.permute.xlu1 %608 }
 0x394   :  { %v1687_v16 = vpop.eup %1686 }
 0x395   :  { %v500_v19 = vmul.f32 %v1687_v16, %v494_v11 }
 0x397   :  { %v502_v20 = vsub.f32 2.0, %v500_v19 }
 0x399   :  { %v504_v23 = vmul.f32 %v1687_v16, %v502_v20 }
 0x39b   :  { %v506_v24 = vmul.f32 %v1679_v54, %v504_v23 }
 0x39d   :  { %1582 = vmatprep.mubr.msk.f32.mxu0 %vm267_vm2, %v506_v24 }
 0x39e   :  { %1583 = vmatmul.mubr.msk.f32.vlgmr.msra.gmra.mxu0 %vm267_vm2, %v507_v25 }
 0x39f   :  { %1586 = vmatpush3.xpose.msk.msra.mxu0 %vm179_vm1, %v613_v13  ;;  %1589 = vmatprep.mubr.msk.f32.mxu0 %vm179_vm1, %v607_v26 }
 0x3a0   :  { %1587 = vmatprep.subr.msk.mxu0 %vm179_vm1, %v611_v27 }
 0x3a3   :  { %1588 = vmatpush3.xpose.msk.msra.mxu0 %vm179_vm1, %v611_v27 }
 0x3a6   :  { %1590 = vmatmul.mubr.msk.f32.vlgmr.msra.gmra.mxu0 %vm179_vm1, %v609_v28 }
 0x429   :  { %v1570_v29 = vpop.f32.mrf.mxu0 }
 0x42a   :  { %384 = vst.msk [vmem:[#allocation2 + $0x8] sm:$0xff] %vm179_vm1, %v1570_v29 }
 0x42b   :  { %v374_v30 = vpop.f32.mrf.mxu0 }
 0x42c   :  { %383 = vst.msk [vmem:[#allocation2] sm:$0xff] %vm179_vm1, %v374_v30 }
 0x45e   :  { %v1968_v31 = vpop.f32.mrf.mxu0 }
 0x460   :  { %v1970_v32 = vpop.f32.mrf.mxu0 }
 0x466   :  { %v1591_v33 = vpop.f32.mrf.mxu0 }
 0x467   :  { %v698_v34 = vmul.f32 0.35355338, %v1591_v33 }
 0x468   :  { %v688_v35 = vpop.f32.mrf.mxu0 }
 0x469   :  { %v697_v36 = vmul.f32 0.35355338, %v688_v35  ;;  %v700_v37 = vadd.f32 %v698_v34, %v1930_v18 }
 0x46b   :  { %v704_v38 = vsel %vm267_vm2, %v700_v37, -inf  ;;  %v699_v39 = vadd.f32 %v697_v36, %v1932_v21 }
 0x46c   :  { %705 = vmax.xlane.f32.xlu1 %v704_v38 }
 0x46d   :  { %v701_v40 = vsel %vm267_vm2, %v699_v39, -inf }
 0x46e   :  { %702 = vmax.xlane.f32.xlu0 %v701_v40 }
 0x47d   :  { %731 = vrot.lane.b32.xlu1 %v1906_v8, %s1789_s24 }
 0x481   :  { %833 = vrot.lane.b32.xlu1 %v1906_v8, %s1790_s0 }
 0x485   :  { %831 = vrot.lane.b32.xlu1 %v1908_v10, %s1790_s0 }
 0x489   :  { %829 = vrot.lane.b32.xlu1 %v1906_v8, %s1791_s25 }
 0x4f5   :  { %v706_v41 = vpop.xlane.xlu1 %705 }
 0x4f6   :  { %v708_v42 = vsub.f32 %v700_v37, %v706_v41 }
 0x4f7   :  { %v703_v43 = vpop.xlane.xlu0 %702 }
 0x4f8   :  { %v707_v44 = vsub.f32 %v699_v39, %v703_v43  ;;  %v711_v46 = vmul.f32 1.442695, %v708_v42 }
 0x4f9   :  { %v732_v45 = vpop.permute.xlu1 %731 }
 0x4fa   :  { %v709_v47 = vmul.f32 1.442695, %v707_v44  ;;  %1592 = vmatprep.subr.mxu1 %v732_v45 }
 0x4fb   :  { %1593 = vmatpush3.msra.mxu1 %v732_v45  ;;  %v1053_v45 = vld [vmem:[%s2105_s4 + $0x18] sm:$0xff] }
 0x4fc   :  { %1688 = vpow2.f32 %v709_v47  ;;  %v1051_v47 = vld [vmem:[%s2105_s4 + $0x8] sm:$0xff] }
 0x4fd   :  { %1690 = vpow2.f32 %v711_v46  ;;  %v834_v55 = vpop.permute.xlu1 %833  ;;  %v1052_v46 = vld [vmem:[%s2105_s4 + $0x10] sm:$0xff] }
 0x501   :  { %v832_v4 = vpop.permute.xlu1 %831 }
 0x505   :  { %v830_v6 = vpop.permute.xlu1 %829 }
 0x509   :  { %v1689_v48 = vpop.eup %1688 }
 0x50a   :  { %v713_v49 = vsel %vm267_vm2, %v1689_v48, 0.0  ;;  %v1691_v50 = vpop.eup %1690 }
 0x50b   :  { %714 = vadd.xlane.f32.xlu0 %v713_v49  ;;  %v716_v51 = vsel %vm267_vm2, %v1691_v50, 0.0 }
 0x50f   :  { %717 = vadd.xlane.f32.xlu0 %v716_v51 }
 0x525   :  { %729 = vrot.lane.b32.xlu0 %v1908_v10, %s1789_s24 }
 0x529   :  { %827 = vrot.lane.b32.xlu0 %v1908_v10, %s1791_s25 }
 0x594   :  { %v715_v52 = vpop.xlane.xlu0 %714 }
 0x595   :  { %1692 = vrcp.f32 %v715_v52 }
 0x598   :  { %v718_v53 = vpop.xlane.xlu0 %717 }
 0x599   :  { %1694 = vrcp.f32 %v718_v53 }
 0x59c   :  { %v730_v54 = vpop.permute.xlu0 %729 }
 0x59d   :  { %1594 = vmatprep.subr.mxu1 %v730_v54 }
 0x59e   :  { %1595 = vmatpush3.msra.mxu1 %v730_v54 }
 0x59f   :  { %1599 = vmatprep.subr.msk.mxu1 %vm179_vm1, %v834_v55 }
 0x5a0   :  { %v828_v3 = vpop.permute.xlu0 %827 }
 0x5a2   :  { %v1693_v56 = vpop.eup %1692 }
 0x5a3   :  { %v721_v57 = vmul.f32 %v1693_v56, %v715_v52 }
 0x5a5   :  { %v723_v58 = vsub.f32 2.0, %v721_v57 }
 0x5a6   :  { %v1695_v59 = vpop.eup %1694 }
 0x5a7   :  { %v725_v60 = vmul.f32 %v1693_v56, %v723_v58  ;;  %v722_v61 = vmul.f32 %v1695_v59, %v718_v53 }
 0x5a9   :  { %v727_v62 = vmul.f32 %v1689_v48, %v725_v60  ;;  %v724_v63 = vsub.f32 2.0, %v722_v61  ;;  %v1050_v48 = vld [vmem:[%s2105_s4] sm:$0xff] }
 0x5ab   :  { %v726_v0 = vmul.f32 %v1695_v59, %v724_v63  ;;  %1596 = vmatprep.mubr.msk.f32.mxu1 %vm267_vm2, %v727_v62 }
 0x5ad   :  { %v728_v1 = vmul.f32 %v1691_v50, %v726_v0 }
 0x5af   :  { %1597 = vmatmul.mubr.msk.f32.vlgmr.msra.gmra.mxu1 %vm267_vm2, %v728_v1 }
 0x5b0   :  { %1600 = vmatpush3.xpose.msk.msra.mxu1 %vm179_vm1, %v834_v55  ;;  %1603 = vmatprep.mubr.msk.f32.mxu1 %vm179_vm1, %v828_v3  ;;  %v1473_v55 = vld [vmem:[%s2106_s5] ss:$0 sm:$0xff] }
 0x5b1   :  { %1601 = vmatprep.subr.msk.mxu1 %vm179_vm1, %v832_v4 }
 0x5b4   :  { %1602 = vmatpush3.xpose.msk.msra.mxu1 %vm179_vm1, %v832_v4 }
 0x5b7   :  { %1604 = vmatmul.mubr.msk.f32.vlgmr.msra.gmra.mxu1 %vm179_vm1, %v830_v6 }
 0x66f   :  { %v1598_v7 = vpop.f32.mrf.mxu1 }
 0x671   :  { %v807_v9 = vpop.f32.mrf.mxu1 }
 0x677   :  { %v1605_v11 = vpop.f32.mrf.mxu1 }
 0x678   :  { %v919_v12 = vmul.f32 0.35355338, %v1605_v11 }
 0x679   :  { %v909_v13 = vpop.f32.mrf.mxu1 }
 0x67a   :  { %v918_v14 = vmul.f32 0.35355338, %v909_v13  ;;  %v921_v15 = vadd.f32 %v919_v12, %v1930_v18  ;;  %v1191_v13 = vld [vmem:[%s2109_s8 + $0x10] sm:$0xff] }
 0x67c   :  { %v925_v16 = vsel %vm267_vm2, %v921_v15, -inf  ;;  %v920_v17 = vadd.f32 %v918_v14, %v1932_v21  ;;  %v1190_v14 = vld [vmem:[%s2109_s8 + $0x8] sm:$0xff] }
 0x67d   :  { %926 = vmax.xlane.f32.xlu1 %v925_v16  ;;  %v1290_v16 = vld [vmem:[%s2111_s10 + $0x38] sm:$0xff] }
 0x67e   :  { %v922_v19 = vsel %vm267_vm2, %v920_v17, -inf }
 0x67f   :  { %923 = vmax.xlane.f32.xlu0 %v922_v19  ;;  %v1288_v19 = vld [vmem:[%s2111_s10 + $0x28] sm:$0xff] }
 0x68e   :  { %952 = vrot.lane.b32.xlu1 %v1906_v8, %s1792_s26 }
 0x692   :  { %597 = vrot.lane.b32.xlu1 %v1970_v32, %s1780_s17 }
 0x696   :  { %599 = vrot.lane.b32.xlu1 %v1968_v31, %s1780_s17 }
 0x69a   :  { %820 = vrot.lane.b32.xlu1 %v1598_v7, %s1793_s27 }
 0x706   :  { %v927_v18 = vpop.xlane.xlu1 %926 }
 0x707   :  { %v929_v20 = vsub.f32 %v921_v15, %v927_v18  ;;  %v1189_v15 = vld [vmem:[%s2109_s8] sm:$0xff] }
 0x708   :  { %v924_v22 = vpop.xlane.xlu0 %923  ;;  %v1287_v18 = vld [vmem:[%s2111_s10 + $0x20] sm:$0xff] }
 0x709   :  { %v928_v21 = vsub.f32 %v920_v17, %v924_v22  ;;  %v932_v24 = vmul.f32 1.442695, %v929_v20  ;;  %v1289_v17 = vld [vmem:[%s2111_s10 + $0x30] sm:$0xff] }
 0x70a   :  { %v953_v23 = vpop.permute.xlu1 %952 }
 0x70b   :  { %v930_v25 = vmul.f32 1.442695, %v928_v21  ;;  %1606 = vmatprep.subr.mxu0 %v953_v23 }
 0x70c   :  { %1607 = vmatpush3.msra.mxu0 %v953_v23 }
 0x70d   :  { %1696 = vpow2.f32 %v930_v25 }
 0x70e   :  { %v598_v8 = vpop.permute.xlu1 %597  ;;  %1698 = vpow2.f32 %v932_v24 }
 0x70f   :  { %604 = vst.msk [vmem:[#allocation2] sm:$0xff] %vm603_vm3, %v598_v8 }
 0x712   :  { %v600_v26 = vpop.permute.xlu1 %599 }
 0x713   :  { %605 = vst.msk [vmem:[#allocation2 + $0x8] sm:$0xff] %vm603_vm3, %v600_v26  ;;  %v1476_v26 = vld [vmem:[%s2107_s6] ss:$0 sm:$0xff] }
 0x716   :  { %v821_v27 = vpop.permute.xlu1 %820 }
 0x717   :  { %826 = vst.msk [vmem:[#allocation2 + $0x8] sm:$0xff] %vm824_vm4, %v821_v27 }
 0x71a   :  { %v1697_v28 = vpop.eup %1696 }
 0x71b   :  { %v934_v29 = vsel %vm267_vm2, %v1697_v28, 0.0  ;;  %v1699_v30 = vpop.eup %1698 }
 0x71c   :  { %935 = vadd.xlane.f32.xlu0 %v934_v29  ;;  %v937_v31 = vsel %vm267_vm2, %v1699_v30, 0.0 }
 0x720   :  { %938 = vadd.xlane.f32.xlu0 %v937_v31 }
 0x736   :  { %950 = vrot.lane.b32.xlu0 %v1908_v10, %s1792_s26 }
 0x73a   :  { %818 = vrot.lane.b32.xlu0 %v807_v9, %s1793_s27 }
 0x7a5   :  { %v936_v32 = vpop.xlane.xlu0 %935 }
 0x7a6   :  { %1700 = vrcp.f32 %v936_v32 }
 0x7a9   :  { %v939_v33 = vpop.xlane.xlu0 %938 }
 0x7aa   :  { %1702 = vrcp.f32 %v939_v33 }
 0x7ad   :  { %v951_v34 = vpop.permute.xlu0 %950 }
 0x7ae   :  { %1608 = vmatprep.subr.mxu0 %v951_v34 }
 0x7af   :  { %1609 = vmatpush3.msra.mxu0 %v951_v34 }
 0x7b0   :  { %1613 = vmatprep.subr.mxu0 %v1053_v45 }
 0x7b1   :  { %v819_v35 = vpop.permute.xlu0 %818 }
 0x7b2   :  { %825 = vst.msk [vmem:[#allocation2] sm:$0xff] %vm824_vm4, %v819_v35  ;;  %v1286_v35 = vld [vmem:[%s2111_s10 + $0x18] sm:$0xff] }
 0x7b3   :  { %v1701_v36 = vpop.eup %1700 }
 0x7b4   :  { %v942_v37 = vmul.f32 %v1701_v36, %v936_v32 }
 0x7b6   :  { %v944_v38 = vsub.f32 2.0, %v942_v37  ;;  %v1284_v37 = vld [vmem:[%s2111_s10 + $0x8] sm:$0xff] }
 0x7b7   :  { %v1703_v39 = vpop.eup %1702 }
 0x7b8   :  { %v946_v40 = vmul.f32 %v1701_v36, %v944_v38  ;;  %v943_v41 = vmul.f32 %v1703_v39, %v939_v33  ;;  %v1285_v36 = vld [vmem:[%s2111_s10 + $0x10] sm:$0xff]  ;;  %v1283_v38 = vld [vmem:[%s2111_s10] sm:$0xff] }
 0x7ba   :  { %v948_v42 = vmul.f32 %v1697_v28, %v946_v40  ;;  %v945_v43 = vsub.f32 2.0, %v943_v41  ;;  %v1477_v28 = vld [vmem:[%s2108_s7] ss:$0 sm:$0xff] }
 0x7bc   :  { %v947_v10 = vmul.f32 %v1703_v39, %v945_v43  ;;  %1610 = vmatprep.mubr.msk.f32.mxu0 %vm267_vm2, %v948_v42  ;;  %v1478_v39 = vld [vmem:[%s2110_s9] ss:$0 sm:$0xff] }
 0x7be   :  { %v949_v44 = vmul.f32 %v1699_v30, %v947_v10 }
 0x7c0   :  { %1611 = vmatmul.mubr.msk.f32.vlgmr.msra.gmra.mxu0 %vm267_vm2, %v949_v44 }
 0x7c1   :  { %1614 = vmatpush3.msra.mxu0 %v1053_v45  ;;  %v1481_v45 = vld [vmem:[%s2112_s11] ss:$0 sm:$0xff] }
 0x7c2   :  { %1615 = vmatprep.subr.mxu0 %v1052_v46 }
 0x7c3   :  { %1616 = vmatpush3.msra.mxu0 %v1052_v46 }
 0x7c4   :  { %1617 = vmatprep.subr.mxu0 %v1051_v47 }
 0x7c5   :  { %1618 = vmatpush3.msra.mxu0 %v1051_v47 }
 0x7c6   :  { %1619 = vmatprep.subr.mxu0 %v1050_v48 }
 0x7c7   :  { %1620 = vmatpush3.msra.mxu0 %v1050_v48 }
 0x7c8   :  { %1635 = vmatprep.subr.mxu0 %v1290_v16 }
 0x880   :  { %v1612_v49 = vpop.f32.mrf.mxu0 }
 0x881   :  { %1041 = vrot.lane.b32.xlu1 %v1612_v49, %s1794_s3 }
 0x882   :  { %v1028_v50 = vpop.f32.mrf.mxu0 }
 0x883   :  { %1039 = vrot.lane.b32.xlu0 %v1028_v50, %s1794_s3 }
 0x8f3   :  { %v1042_v51 = vpop.permute.xlu1 %1041 }
 0x8f4   :  { %1047 = vst.msk [vmem:[#allocation2 + $0x8] sm:$0xff] %vm1045_vm5, %v1042_v51 }
 0x8f5   :  { %v1040_v52 = vpop.permute.xlu0 %1039 }
 0x8f6   :  { %1046 = vst.msk [vmem:[#allocation2] sm:$0xff] %vm1045_vm5, %v1040_v52 }
 0x8fb   :  { %v1049_v54 = vld [vmem:[#allocation2 + $0x8] sm:$0xff] }
 0x8fd   :  { %v1048_v53 = vld [vmem:[#allocation2] sm:$0xff] }
 0x8fe   :  { %1621 = vmatprep.mubr.msk.f32.mxu0 %vm91_vm0, %v1048_v53 }
 0x8ff   :  { %1622 = vmatmul.mubr.msk.f32.vlgmr.msra.gmra.mxu0 %vm91_vm0, %v1049_v54 }
 0x900   :  { %1636 = vmatpush3.msra.mxu0 %v1290_v16 }
 0x901   :  { %1637 = vmatprep.subr.mxu0 %v1289_v17 }
 0x902   :  { %1638 = vmatpush3.msra.mxu0 %v1289_v17 }
 0x903   :  { %1639 = vmatprep.subr.mxu0 %v1288_v19 }
 0x904   :  { %1640 = vmatpush3.msra.mxu0 %v1288_v19 }
 0x905   :  { %1641 = vmatprep.subr.mxu0 %v1287_v18 }
 0x906   :  { %1642 = vmatpush3.msra.mxu0 %v1287_v18 }
 0x907   :  { %1643 = vmatprep.subr.mxu0 %v1286_v35 }
 0x908   :  { %1644 = vmatpush3.msra.mxu0 %v1286_v35 }
 0x909   :  { %1645 = vmatprep.subr.mxu0 %v1285_v36 }
 0x90a   :  { %1646 = vmatpush3.msra.mxu0 %v1285_v36 }
 0x90b   :  { %1647 = vmatprep.subr.mxu0 %v1284_v37 }
 0x90c   :  { %1648 = vmatpush3.msra.mxu0 %v1284_v37 }
 0x90d   :  { %1649 = vmatprep.subr.mxu0 %v1283_v38 }
 0x90e   :  { %1650 = vmatpush3.msra.mxu0 %v1283_v38 }
 0x9bf   :  { %v1623_v56 = vpop.f32.mrf.mxu0 }
 0x9c0   :  { %v1139_v57 = vadd.f32 %v1623_v56, %v1473_v55 }
 0x9c1   :  { %v1133_v58 = vpop.f32.mrf.mxu0 }
 0x9c2   :  { %v1134_v59 = vadd.f32 %v1473_v55, %v1133_v58  ;;  %v1143_v60 = vadd.f32 %v1139_v57, %v1899_v5 }
 0x9c4   :  { %v1149_v61 = vsel %vm91_vm0, %v1143_v60, 0.0  ;;  %v1142_v62 = vadd.f32 %v1134_v59, %v1889_v2  ;;  %v1192_v2 = vld [vmem:[%s2109_s8 + $0x18] sm:$0xff] }
 0x9c5   :  { %1150 = vadd.xlane.f32.xlu1 %v1149_v61  ;;  %1624 = vmatprep.subr.mxu1 %v1192_v2 }
 0x9c6   :  { %v1146_v63 = vsel %vm91_vm0, %v1142_v62, 0.0  ;;  %1625 = vmatpush3.msra.mxu1 %v1192_v2  ;;  %v1485_v2 = vld [vmem:[%s2114_s13] ss:$0 sm:$0xff] }
 0x9c7   :  { %1147 = vadd.xlane.f32.xlu0 %v1146_v63  ;;  %1626 = vmatprep.subr.mxu1 %v1191_v13 }
 0x9c8   :  { %1627 = vmatpush3.msra.mxu1 %v1191_v13 }
 0x9c9   :  { %1628 = vmatprep.subr.mxu1 %v1190_v14 }
 0x9ca   :  { %1629 = vmatpush3.msra.mxu1 %v1190_v14 }
 0x9cb   :  { %1630 = vmatprep.subr.mxu1 %v1189_v15 }
 0x9cc   :  { %1631 = vmatpush3.msra.mxu1 %v1189_v15 }
 0xa4e   :  { %v1151_v0 = vpop.xlane.xlu1 %1150 }
 0xa4f   :  { %v1154_v1 = vmul.f32 0.03125, %v1151_v0 }
 0xa50   :  { %v1148_v3 = vpop.xlane.xlu0 %1147 }
 0xa51   :  { %v1153_v4 = vmul.f32 0.03125, %v1148_v3  ;;  %v1156_v6 = vsub.f32 %v1143_v60, %v1154_v1 }
 0xa53   :  { %v1155_v7 = vsub.f32 %v1142_v62, %v1153_v4  ;;  %v1158_v12 = vmul.f32 %v1156_v6, %v1156_v6 }
 0xa55   :  { %v1157_v9 = vmul.f32 %v1155_v7, %v1155_v7  ;;  %v1162_v5 = vsel %vm91_vm0, %v1158_v12, 0.0 }
 0xa57   :  { %v1159_v11 = vsel %vm91_vm0, %v1157_v9, 0.0 }
 0xa58   :  { %1160 = vadd.xlane.f32.xlu0 %v1159_v11  ;;  %v1484_v11 = vld [vmem:[%s2113_s12] ss:$0 sm:$0xff] }
 0xa5c   :  { %1163 = vadd.xlane.f32.xlu0 %v1162_v5 }
 0xae1   :  { %v1161_v20 = vpop.xlane.xlu0 %1160 }
 0xae2   :  { %v1165_v22 = vmul.f32 0.03125, %v1161_v20 }
 0xae4   :  { %v1167_v21 = vadd.f32 1e-05, %v1165_v22 }
 0xae5   :  { %v1164_v23 = vpop.xlane.xlu0 %1163 }
 0xae6   :  { %1704 = vrsqrt.f32 %v1167_v21  ;;  %v1166_v24 = vmul.f32 0.03125, %v1164_v23 }
 0xae8   :  { %v1168_v25 = vadd.f32 1e-05, %v1166_v24 }
 0xaea   :  { %1706 = vrsqrt.f32 %v1168_v25 }
 0xaf3   :  { %v1705_v8 = vpop.eup %1704 }
 0xaf4   :  { %v1171_v27 = vmul.f32 %v1705_v8, %v1155_v7 }
 0xaf6   :  { %v1179_v29 = vmul.f32 %v1476_v26, %v1171_v27 }
 0xaf7   :  { %v1707_v30 = vpop.eup %1706 }
 0xaf8   :  { %v1172_v31 = vmul.f32 %v1707_v30, %v1156_v6  ;;  %v1187_v32 = vadd.f32 %v1477_v28, %v1179_v29 }
 0xafa   :  { %v1180_v33 = vmul.f32 %v1476_v26, %v1172_v31  ;;  %1632 = vmatprep.mubr.msk.f32.mxu1 %vm91_vm0, %v1187_v32 }
 0xafc   :  { %v1188_v34 = vadd.f32 %v1477_v28, %v1180_v33 }
 0xafe   :  { %1633 = vmatmul.mubr.msk.f32.vlgmr.msra.gmra.mxu1 %vm91_vm0, %v1188_v34 }
 0xbbe   :  { %v1634_v40 = vpop.f32.mrf.mxu1 }
 0xbbf   :  { %v1278_v41 = vadd.f32 %v1634_v40, %v1478_v39 }
 0xbc0   :  { %v1272_v42 = vpop.f32.mrf.mxu1 }
 0xbc1   :  { %v1273_v43 = vadd.f32 %v1478_v39, %v1272_v42  ;;  %v1282_v44 = vmax.f32 %v1278_v41, 0.0 }
 0xbc3   :  { %v1281_v10 = vmax.f32 %v1273_v43, 0.0 }
 0xbc5   :  { %1651 = vmatprep.mubr.msk.f32.mxu0 %vm1298_vm6, %v1281_v10 }
 0xbc6   :  { %1652 = vmatmul.mubr.msk.f32.vlgmr.msra.gmra.mxu0 %vm1298_vm6, %v1282_v44 }
 0xc86   :  { %v1653_v46 = vpop.f32.mrf.mxu0 }
 0xc87   :  { %v1377_v47 = vadd.f32 %v1653_v46, %v1481_v45 }
 0xc88   :  { %v1371_v48 = vpop.f32.mrf.mxu0 }
 0xc89   :  { %v1372_v49 = vadd.f32 %v1481_v45, %v1371_v48  ;;  %v1381_v50 = vadd.f32 %v1377_v47, %v1188_v34 }
 0xc8b   :  { %v1387_v51 = vsel %vm91_vm0, %v1381_v50, 0.0  ;;  %v1380_v52 = vadd.f32 %v1372_v49, %v1187_v32 }
 0xc8c   :  { %1388 = vadd.xlane.f32.xlu0 %v1387_v51 }
 0xc8d   :  { %v1384_v53 = vsel %vm91_vm0, %v1380_v52, 0.0 }
 0xc8e   :  { %1385 = vadd.xlane.f32.xlu1 %v1384_v53 }
 0xd15   :  { %v1389_v54 = vpop.xlane.xlu0 %1388 }
 0xd16   :  { %v1391_v55 = vmul.f32 0.03125, %v1389_v54 }
 0xd17   :  { %v1386_v56 = vpop.xlane.xlu1 %1385 }
 0xd18   :  { %v1393_v57 = vsub.f32 %v1381_v50, %v1391_v55  ;;  %v1390_v58 = vmul.f32 0.03125, %v1386_v56 }
 0xd1a   :  { %v1392_v59 = vsub.f32 %v1380_v52, %v1390_v58  ;;  %v1395_v60 = vmul.f32 %v1393_v57, %v1393_v57 }
 0xd1c   :  { %v1399_v61 = vsel %vm91_vm0, %v1395_v60, 0.0  ;;  %v1394_v62 = vmul.f32 %v1392_v59, %v1392_v59 }
 0xd1d   :  { %1400 = vadd.xlane.f32.xlu0 %v1399_v61 }
 0xd1e   :  { %v1396_v63 = vsel %vm91_vm0, %v1394_v62, 0.0 }
 0xd1f   :  { %1397 = vadd.xlane.f32.xlu1 %v1396_v63 }
 0xda6   :  { %v1401_v0 = vpop.xlane.xlu0 %1400 }
 0xda7   :  { %v1403_v1 = vmul.f32 0.03125, %v1401_v0 }
 0xda8   :  { %v1398_v3 = vpop.xlane.xlu1 %1397 }
 0xda9   :  { %v1405_v4 = vadd.f32 1e-05, %v1403_v1  ;;  %v1402_v6 = vmul.f32 0.03125, %v1398_v3 }
 0xdab   :  { %1708 = vrsqrt.f32 %v1405_v4  ;;  %v1404_v7 = vadd.f32 1e-05, %v1402_v6 }
 0xdad   :  { %1710 = vrsqrt.f32 %v1404_v7 }
 0xdb8   :  { %v1709_v9 = vpop.eup %1708 }
 0xdb9   :  { %v1409_v12 = vmul.f32 %v1709_v9, %v1393_v57 }
 0xdba   :  { %v1711_v5 = vpop.eup %1710 }
 0xdbb   :  { %v1408_v13 = vmul.f32 %v1711_v5, %v1392_v59  ;;  %v1417_v14 = vmul.f32 %v1484_v11, %v1409_v12 }
 0xdbd   :  { %v1416_v15 = vmul.f32 %v1484_v11, %v1408_v13  ;;  %v1425_v16 = vadd.f32 %v1485_v2, %v1417_v14 }
 0xdbf   :  { %v1424_v17 = vadd.f32 %v1485_v2, %v1416_v15  ;;  %1427 = vst.msk [vmem:[#allocation8 + $0x8] sm:$0xff] %vm91_vm0, %v1425_v16 }
 0xdc1   :  { %1426 = vst.msk [vmem:[#allocation8] sm:$0xff] %vm91_vm0, %v1424_v17 }
 0xdc2   :  { %1763 = shalt.err (!%p1760_p0)
}
 0xdc3   :  { %1439 = dma.vmem_to_hbm [thread:$0]  %s1434_s1, 256, %s2115_s14, [#allocation5], %s1779_s16, %s1779_s16, %s1780_s17  }
 0xdc4   :  { %1776 = dma.done.wait [#allocation5], 256  }
 0xdc5   :  { %1777 = vsyncadd [#allocation5], 4294967040 }
 0xdc6   :  { %1443 = vsyncpa [#allocation4], 1 }
 0xdc7   :  { %1444 = vsyncpa [#allocation7], 1 }
 0xdc8   :  { %1445 = vsyncpa [#allocation5], 1 }

</bundles_post_ra>
